<compile_context>
chip_gen: v5e
topology: v5e:2x2
jax: 0.10.0
libtpu: 0.0.40
codegen_flags: <defaults>
</compile_context>

<pallas_src>
import functools

import jax
import jax.numpy as jnp
import numpy as np
from jax.experimental import pallas as pl
from jax.experimental.pallas import tpu as pltpu


def _gcn_kernel(x_ref, y_ref, a_ref, d_ref, o_ref, *, inv_num_rel):
    """One grid step: (dst tile i, src tile k, relation r).

    x_ref  : (TM, Fp)   destination-node features (residual term, resident per i), f32
    y_ref  : (TK, Fp)   projected source features Y = X @ W, bf16 (relation-invariant)
    a_ref  : (TM, TK)   0/1 adjacency tile (bf16, dst x src) for relation r
    d_ref  : (R, TM, 1) precomputed 1/in-degree for dst tile i, all relations (resident)
    o_ref  : (TM, Fp)   output tile, f32 — doubles as the (k, r) accumulator
    """
    k = pl.program_id(1)
    r = pl.program_id(2)
    n_k = pl.num_programs(1)
    n_rel = pl.num_programs(2)

    @pl.when(jnp.logical_and(k == 0, r == 0))
    def _():
        o_ref[...] = jnp.zeros_like(o_ref)

    # bf16 x bf16 -> f32 accumulate on the MXU (adjacency 0/1 and Y both bf16).
    msg = jnp.dot(a_ref[...], y_ref[...], preferred_element_type=jnp.float32)  # (TM, Fp)
    # Per-step scaling by 1/deg_r is equivalent to scaling the full k-sum (linear).
    o_ref[...] += msg * d_ref[r]

    @pl.when(jnp.logical_and(k == n_k - 1, r == n_rel - 1))
    def _():
        # Cross-relation mean + single residual add, in place.
        o_ref[...] = (o_ref[...] * inv_num_rel + x_ref[...]).astype(o_ref.dtype)


def _round_up(v, m):
    return (v + m - 1) // m * m


def _pick_tiles(n, tm_max, tk_max):
    """Cap tiles for small graphs; keep >= 2 dst tiles when possible (v7x megacore)."""
    n128 = _round_up(n, 128)
    tm = min(tm_max, n128)
    while tm > 128 and _round_up(n, tm) // tm < 2:
        tm -= 128
    tk = min(tk_max, n128)
    return tm, tk


def gcn_layer_forward(x, w, adj, *, tm=512, tk=512, lane=128):
    """x: [N, F] f32, w: [F, F] f32, adj: [R, N, N] f32, adj[r, v, u] = edge u -> v."""
    N, F = x.shape
    R = adj.shape[0]

    tm, tk = _pick_tiles(N, tm, tk)
    Nd = _round_up(N, tm)   # padded destination-node axis
    Ns = _round_up(N, tk)   # padded source-node axis
    Fp = _round_up(F, lane)

    # Degrees from the UNPADDED f32 adjacency (exact); safe for 0-degree / padded rows.
    deg = jnp.sum(adj, axis=-1, keepdims=True)                       # [R, N, 1]
    inv_deg = jnp.where(deg > 0, 1.0 / deg, 0.0).astype(jnp.float32)
    inv_deg = jnp.pad(inv_deg, ((0, 0), (0, Nd - N), (0, 0)))        # [R, Nd, 1]

    # Single padded adjacency copy, already bf16 (0/1 exact in bf16).
    adj_b = jnp.pad(adj.astype(jnp.bfloat16), ((0, 0), (0, Nd - N), (0, Ns - N)))

    # Hoisted relation-invariant projection; streamed to the kernel in bf16.
    y = jnp.dot(x, w, precision=jax.lax.Precision.HIGHEST)           # [N, F] f32
    y_b = jnp.pad(y, ((0, Ns - N), (0, Fp - F))).astype(jnp.bfloat16)

    # Residual term lives on the destination-node axis.
    x_d = jnp.pad(x, ((0, Nd - N), (0, Fp - F)))                     # [Nd, Fp] f32

    n_i, n_k = Nd // tm, Ns // tk
    kernel = functools.partial(_gcn_kernel, inv_num_rel=1.0 / R)

    out_p = pl.pallas_call(
        kernel,
        out_shape=jax.ShapeDtypeStruct((Nd, Fp), x.dtype),
        grid_spec=pltpu.PrefetchScalarGridSpec(
            num_scalar_prefetch=0,
            # Relation axis innermost: Y tile is fetched once per (i, k), not once per r.
            grid=(n_i, n_k, R),
            in_specs=[
                pl.BlockSpec((tm, Fp), lambda i, k, r: (i, 0)),           # x residual (dst)
                pl.BlockSpec((tk, Fp), lambda i, k, r: (k, 0)),           # Y (src, bf16)
                pl.BlockSpec((None, tm, tk), lambda i, k, r: (r, i, k)),  # adjacency tile
                pl.BlockSpec((R, tm, 1), lambda i, k, r: (0, i, 0)),      # 1/deg, resident
            ],
            out_specs=pl.BlockSpec((tm, Fp), lambda i, k, r: (i, 0)),     # acc-in-output
        ),
        compiler_params=pltpu.CompilerParams(
            dimension_semantics=("parallel", "arbitrary", "arbitrary"),
        ),
    )(x_d, y_b, adj_b, inv_deg)

    return out_p[:N, :F]


def gcn_layer_ref(x, w, adj):
    y = jnp.dot(x, w, precision=jax.lax.Precision.HIGHEST)
    deg = adj.sum(axis=-1, keepdims=True)                               # [R, N, 1]
    msg = jnp.einsum("rvu,uf->rvf", adj, y,
                     precision=jax.lax.Precision.HIGHEST) / deg         # per-relation mean
    h_r = msg + x[None, :, :]                                           # residual per relation
    return h_r.mean(axis=0)                                             # cross-etype mean


if __name__ == "__main__":
    key = jax.random.PRNGKey(0)
    k_x, k_w, k_a = jax.random.split(key, 3)

    N = 200   # nodes (not a multiple of 128 -> exercises node-axis padding & tile capping)
    F = 48    # in_feats == out_feats (required by the residual); padded to 128 lanes
    R = 3     # number of relations (edge types)

    # Deterministic parameter init (nn.Linear weight, no bias), kaiming-uniform-ish.
    bound = 1.0 / np.sqrt(F)
    w = jax.random.uniform(k_w, (F, F), jnp.float32, -bound, bound)

    # Node features.
    x = jax.random.normal(k_x, (N, F), jnp.float32)

    # Dense adjacency per relation; self-loop guarantees in-degree >= 1 per relation
    # (matches DGL semantics where only message-receiving nodes reduce).
    a = (jax.random.uniform(k_a, (R, N, N)) < 0.15).astype(jnp.float32)
    eye = jnp.eye(N, dtype=jnp.float32)[None, :, :]
    adj = jnp.maximum(a, eye)

    out = jax.block_until_ready(gcn_layer_forward(x, w, adj))
    ref = gcn_layer_ref(x, w, adj)
    # Y is streamed in bf16 (deliberate perf choice) -> tolerance loosened vs f32 ref.
    np.testing.assert_allclose(np.asarray(out), np.asarray(ref), rtol=1e-2, atol=1e-2)

    print("KERNEL_OK")
</pallas_src>

<mosaic_0001>
module attributes {stable_mosaic.version = 11 : i64} {
  func.func @_gcn_kernel(%arg0: i32, %arg1: i32, %arg2: i32, %arg3: memref<128x128xf32, #tpu.memory_space<vmem>>, %arg4: memref<256x128xbf16, #tpu.memory_space<vmem>>, %arg5: memref<1x128x256xbf16, #tpu.memory_space<vmem>>, %arg6: memref<3x128x1xf32, #tpu.memory_space<vmem>>, %arg7: memref<128x128xf32, #tpu.memory_space<vmem>>) attributes {dimension_semantics = [#tpu.dimension_semantics<parallel>, #tpu.dimension_semantics<arbitrary>, #tpu.dimension_semantics<arbitrary>], iteration_bounds = array<i64: 2, 1, 3>, scalar_prefetch = 0 : i64, scratch_operands = 0 : i64, tpu.core_type = #tpu.core_type<tc>, window_params = [{transform_indices = @transform_0, window_bounds = array<i64: 128, 128>}, {transform_indices = @transform_1, window_bounds = array<i64: 256, 128>}, {transform_indices = @transform_2, window_bounds = array<i64: 1, 128, 256>}, {transform_indices = @transform_3, window_bounds = array<i64: 3, 128, 1>}, {transform_indices = @transform_4, window_bounds = array<i64: 128, 128>}]} {
    %c0_i32 = arith.constant 0 : i32
    %0 = arith.cmpi eq, %arg1, %c0_i32 : i32
    %c0_i32_0 = arith.constant 0 : i32
    %1 = arith.cmpi eq, %arg2, %c0_i32_0 : i32
    %2 = arith.andi %0, %1 : i1
    %3 = arith.extui %2 : i1 to i32
    %c0_i32_1 = arith.constant 0 : i32
    %4 = arith.cmpi ne, %3, %c0_i32_1 : i32
    scf.if %4 {
      %cst_14 = arith.constant 0.000000e+00 : f32
      %22 = vector.broadcast %cst_14 : f32 to vector<128x128xf32>
      %c0_15 = arith.constant 0 : index
      %c0_16 = arith.constant 0 : index
      %23 = vector.load %arg7[%c0_15, %c0_16] : memref<128x128xf32, #tpu.memory_space<vmem>>, vector<128x128xf32>
      tpu.vector_store %arg7[%c0_15, %c0_16], %22 {strides = array<i32>} : memref<128x128xf32, #tpu.memory_space<vmem>>, vector<128x128xf32>,
    } else {
    }
    %c0 = arith.constant 0 : index
    %c0_2 = arith.constant 0 : index
    %c0_3 = arith.constant 0 : index
    %5 = vector.load %arg5[%c0, %c0_2, %c0_3] : memref<1x128x256xbf16, #tpu.memory_space<vmem>>, vector<1x128x256xbf16>
    %6 = vector.shape_cast %5 : vector<1x128x256xbf16> to vector<128x256xbf16>
    %c0_4 = arith.constant 0 : index
    %c0_5 = arith.constant 0 : index
    %7 = vector.load %arg4[%c0_4, %c0_5] : memref<256x128xbf16, #tpu.memory_space<vmem>>, vector<256x128xbf16>
    %cst = arith.constant dense<0.000000e+00> : vector<128x128xf32>
    %8 = tpu.matmul %6, %7, %cst {dimension_numbers = #tpu.dot_dimension_numbers<[1], [0], [0], [1], [0, 0, 1, 1], [], []>} : vector<128x256xbf16>, vector<256x128xbf16>, vector<128x128xf32> -> vector<128x128xf32>
    %c0_6 = arith.constant 0 : index
    %c0_7 = arith.constant 0 : index
    %9 = vector.load %arg7[%c0_6, %c0_7] : memref<128x128xf32, #tpu.memory_space<vmem>>, vector<128x128xf32>
    %10 = arith.index_cast %arg2 : i32 to index
    %c0_8 = arith.constant 0 : index
    %c0_9 = arith.constant 0 : index
    %11 = vector.load %arg6[%10, %c0_8, %c0_9] : memref<3x128x1xf32, #tpu.memory_space<vmem>>, vector<1x128x1xf32>
    %12 = vector.shape_cast %11 : vector<1x128x1xf32> to vector<128x1xf32>
    %13 = vector.broadcast %12 : vector<128x1xf32> to vector<128x128xf32>
    %14 = arith.mulf %8, %13 : vector<128x128xf32>
    %15 = arith.addf %9, %14 : vector<128x128xf32>
    %c0_10 = arith.constant 0 : index
    %c0_11 = arith.constant 0 : index
    %16 = vector.load %arg7[%c0_10, %c0_11] : memref<128x128xf32, #tpu.memory_space<vmem>>, vector<128x128xf32>
    tpu.vector_store %arg7[%c0_10, %c0_11], %15 {strides = array<i32>} : memref<128x128xf32, #tpu.memory_space<vmem>>, vector<128x128xf32>,
    %c0_i32_12 = arith.constant 0 : i32
    %17 = arith.cmpi eq, %arg1, %c0_i32_12 : i32
    %c2_i32 = arith.constant 2 : i32
    %18 = arith.cmpi eq, %arg2, %c2_i32 : i32
    %19 = arith.andi %17, %18 : i1
    %20 = arith.extui %19 : i1 to i32
    %c0_i32_13 = arith.constant 0 : i32
    %21 = arith.cmpi ne, %20, %c0_i32_13 : i32
    scf.if %21 {
      %c0_14 = arith.constant 0 : index
      %c0_15 = arith.constant 0 : index
      %22 = vector.load %arg7[%c0_14, %c0_15] : memref<128x128xf32, #tpu.memory_space<vmem>>, vector<128x128xf32>
      %cst_16 = arith.constant 0.333333343 : f32
      %23 = vector.broadcast %cst_16 : f32 to vector<128x128xf32>
      %24 = arith.mulf %22, %23 : vector<128x128xf32>
      %c0_17 = arith.constant 0 : index
      %c0_18 = arith.constant 0 : index
      %25 = vector.load %arg3[%c0_17, %c0_18] : memref<128x128xf32, #tpu.memory_space<vmem>>, vector<128x128xf32>
      %26 = arith.addf %24, %25 : vector<128x128xf32>
      %c0_19 = arith.constant 0 : index
      %c0_20 = arith.constant 0 : index
      %27 = vector.load %arg7[%c0_19, %c0_20] : memref<128x128xf32, #tpu.memory_space<vmem>>, vector<128x128xf32>
      tpu.vector_store %arg7[%c0_19, %c0_20], %26 {strides = array<i32>} : memref<128x128xf32, #tpu.memory_space<vmem>>, vector<128x128xf32>,
    } else {
    }
    return
  }
  func.func @transform_0(%arg0: i32, %arg1: i32, %arg2: i32) -> (i32, i32) {
    %c0_i32 = arith.constant 0 : i32
    %c0_i32_0 = arith.constant 0 : i32
    return %arg0, %c0_i32 : i32, i32
  }
  func.func @transform_1(%arg0: i32, %arg1: i32, %arg2: i32) -> (i32, i32) {
    %c0_i32 = arith.constant 0 : i32
    %c0_i32_0 = arith.constant 0 : i32
    return %arg1, %c0_i32 : i32, i32
  }
  func.func @transform_2(%arg0: i32, %arg1: i32, %arg2: i32) -> (i32, i32, i32) {
    %c0_i32 = arith.constant 0 : i32
    return %arg2, %arg0, %arg1 : i32, i32, i32
  }
  func.func @transform_3(%arg0: i32, %arg1: i32, %arg2: i32) -> (i32, i32, i32) {
    %c0_i32 = arith.constant 0 : i32
    %c0_i32_0 = arith.constant 0 : i32
    %c0_i32_1 = arith.constant 0 : i32
    return %c0_i32, %arg0, %c0_i32_0 : i32, i32, i32
  }
  func.func @transform_4(%arg0: i32, %arg1: i32, %arg2: i32) -> (i32, i32) {
    %c0_i32 = arith.constant 0 : i32
    %c0_i32_0 = arith.constant 0 : i32
    return %arg0, %c0_i32 : i32, i32
  }
}

</mosaic_0001>

<bundles_post_ra>
// kernel: tpu_custom_call.1
= control target key start
LH: loop header
LB: loop body
LE: loop exit
PB: predicated region body
PF: predicated region fallthrough
CT: control target
= control target key end

     0   :  { %s2258_s0 = inlined_call_operand.hbm [shape: f32[256,128], index: 0, kind: input, shape index: {}]   ;;  %s2259_s1 = inlined_call_operand.hbm [shape: bf16[256,128], index: 1, kind: input, shape index: {}]   ;;  %s2260_s2 = inlined_call_operand.vmem [shape: bf16[3,256,256], index: 2, kind: input, shape index: {}]   ;;  %s2261_s3 = inlined_call_operand.vmem [shape: f32[3,256,1], index: 3, kind: input, shape index: {}]   ;;  %s2262_s4 = inlined_call_operand.hbm [shape: f32[256,128], index: 4, kind: output, shape index: {}]  }
   0x1   :  { %2267 = sst [smem:[#allocation18_spill]] %s2259_s1 }
   0x2   :  { %9 = vsyncpa [#allocation3], 0 }
   0x3   :  { %11 = vsyncpa [#allocation3 + $0x1], 0 }
   0x4   :  { %12 = vsyncpa [#allocation6], 0 }
   0x5   :  { %13 = vsyncpa [#allocation4], 0 }
   0x6   :  { %15 = vsyncpa [#allocation4 + $0x1], 0  ;;  %s1815_s15 = smov 0   ;;  %s1817_s16 = smov 0  }
   0x7   :  { %s1819_s17 = smov 0   ;;  %s1821_s18 = smov 0  }
   0x8   :  { %s1823_s19 = smov 0   ;;  %s1825_s20 = smov 0  }
   0x9   :  { %s1827_s21 = smov 0   ;;  %s1829_s22 = smov 0  }
   0xa LB: > { %2268 = sst [smem:[#allocation12_spill]] %s1759_s17  ;;  %s1315_s23 = sadd.s32 4294967295, %s1779_s22   ;;  %s1779_s22 = sphi %s1829_s22, %s21_s22   ;;  %s1775_s21 = sphi %s1827_s21, %s2286_s21   ;;  %s1771_s20 = sphi %s1825_s20, %s2285_s20   ;;  %s1767_s19 = sphi %s1823_s19, %s2284_s19   ;;  %s1763_s18 = sphi %s1821_s18, %s2283_s18   ;;  %s1759_s17 = sphi %s1819_s17, %s2282_s17   ;;  %s1755_s16 = sphi %s1817_s16, %s2288_s16   ;;  %s1751_s15 = sphi %s1815_s15, %s2287_s15  }
   0xb   : > { %2269 = sst [smem:[#allocation13_spill]] %s1771_s20  ;;  %s1316_s24 = sadd.s32 4294967294, %s1779_s22  }
   0xc   : > { %2270 = sst [smem:[#allocation14_spill]] %s1775_s21  ;;  %s33_s25 = sadd.s32 1, %s1771_s20 }
   0xd   : > { %s40_s26 = sadd.s32 1, %s1775_s21  ;;  %p34_p0 = scmp.ge.s32.totalorder %s33_s25, 3 }
   0xe   : > { %s47_s27 = sadd.s32 1, %s1759_s17  ;;  %p54_p1 = scmp.ne.s32.totalorder %s1759_s17, %s1755_s16 }
   0xf   : > { %p55_p2 = scmp.eq.s32.totalorder %s1779_s22, 0  ;;  %s2290_s25 = smov (%p34_p0, %s33_s25), 0 }
  0x10   : > { %2271 = sst [smem:[#allocation15_spill]] %s2290_s25  ;;  %s2292_s26 = smov (!%p34_p0, %s40_s26), %s1775_s21 }
  0x11   : > { %p1866_p3 = por %p55_p2, %p54_p1  ;;  %p60_p4 = scmp.ne.s32.totalorder %s1755_s16, %s1751_s15 }
  0x12   : > { %p42_p5 = scmp.ge.s32.totalorder %s2292_s26, 2  ;;  %p1872_p6 = scmp.eq.s32.totalorder %s1315_s23, 0 }
  0x13   : > { %p166_p7 = scmp.eq.s32.totalorder %s1315_s23, 5  ;;  %p172_p8 = scmp.eq.s32.totalorder %s1316_s24, 5 }
  0x14   : > { %s2294_s26 = smov (%p42_p5, %s2292_s26), 0  ;;  %p1880_p9 = por %p1872_p6, %p60_p4 }
  0x15   : > { %2274 = sst [smem:[#allocation16_spill]] %s2294_s26  ;;  %p1884_p10 = por %p166_p7, %p54_p1 }
  0x16   : > { %s44_s6 = ssub.s32 %s1775_s21, %s2294_s26  ;;  %p1890_p11 = por %p172_p8, %p60_p4 }
  0x17   : > { %p45_p12 = scmp.eq.s32.totalorder %s44_s6, 0  ;;  %p1317_p13 = scmp.ge.s32.totalorder %s1779_s22, 1 }
  0x18   : > { %p179_p0 = scmp.lt.s32.totalorder %s1779_s22, 7  ;;  %s2280_s1 = sld [smem:[#allocation18_spill]] }
  0x19   : > { %s1897_s8 = scalar_select %p45_p12, %s1759_s17, %s47_s27  }
  0x1a   : > { %p1899_p2 = pnand %p1317_p13, %p179_p0  ;;  %s1781_s13 = smov [#allocation5]  }
  0x1b   : > { %2278 = sst [smem:[#allocation17_spill]] %s1897_s8  ;;  %s195_s14 = sshll.u32 %s1781_s13, 4  ;;  %s196_s14 = int_to_ptr.vmem [resolvable:$true] %s195_s14 }
  0x1c   : > { %p1532_p1 = pneg %p1899_p2  ;;  %s1782_s23 = smov 64  }
  0x1d   : > { %s1783_s24 = smov 4   ;;  %p1319_p5 = scmp.ge.s32.totalorder %s1779_s22, 6 }
  0x1e   : > { %s193_s12 = sshll.u32 %s2280_s1, 4  ;;  %p1533_p4 = pnand %p1532_p1, %p1872_p6  ;;  %s194_s12 = int_to_ptr.hbm [resolvable:$true] %s193_s12 }
  0x1f   : > { %205 = sbr.rel (%p1319_p5) target bundleno = 90 (0x5a), region = 20  ;;  %s209_s27 = sand.u32 (!%p1319_p5), 1, %s1759_s17  }
  0x20   : > { %1535 = dma.hbm_to_vmem [thread:$0]  (!%p1533_p4), %s194_s12, 2048, %s196_s14, [#allocation6], %s1782_s23, %s1782_s23, %s1783_s24  }
  0x21   : > { %s1469_s6 = sshll.u32 (!%p1319_p5), %s1775_s21, 7  ;;  %s1320_s10 = sshll.u32 (!%p1319_p5), %s209_s27, 7 }
  0x22   : > { %s218_s26 = scalar_lea.hbm (!%p1319_p5), %s2258_s0, %s1469_s6  ;;  %s213_s25 = scalar_lea.vmem (!%p1319_p5), [#allocation2], %s1320_s10 }
  0x23   : > { %s219_s13 = sshll.u32 (!%p1319_p5), %s218_s26, 4  ;;  %s221_s20 = sshll.u32 (!%p1319_p5), %s213_s25, 4  ;;  %s220_s13 = int_to_ptr.hbm [resolvable:$true] %s219_s13  ;;  %s222_s20 = int_to_ptr.vmem [resolvable:$true] %s221_s20 }
  0x24   : > { %s210_s8 = scalar_lea.sflag [#allocation3], %s209_s27  ;;  %s1784_s12 = smov 128  }
  0x25   : > { %s1785_s14 = smov 8   ;;  %249 = sbr.rel (!%p1866_p3) target bundleno = 90 (0x5a), region = 32 }
  0x26   : > { %1526 = dma.hbm_to_vmem [thread:$0]  (%p1866_p3), %s220_s13, 2048, %s222_s20, %s210_s8, %s1784_s12, %s1784_s12, %s1785_s14  }
  0x27   : > { %s1522_s23 = smul.u32 (%p1866_p3), 384, %s209_s27  ;;  %s1923_s17 = scalar_lea.vmem (%p1866_p3), %s2261_s3, %s1469_s6 }
  0x28   : > { %v379_v0 = vld [vmem:[%s1923_s17] sm:$0xff] (%p1866_p3)  ;;  %v381_v1 = vld [vmem:[%s1923_s17 + $0x8] sm:$0xff] (%p1866_p3)  ;;  %v383_v2 = vld [vmem:[%s1923_s17 + $0x10] sm:$0xff] (%p1866_p3) }
  0x29   : > { %s1928_s1 = scalar_lea.vmem (%p1866_p3), [#allocation7], %s1522_s23  ;;  %v385_v3 = vld [vmem:[%s1923_s17 + $0x18] sm:$0xff] (%p1866_p3)  ;;  %v387_v4 = vld [vmem:[%s1923_s17 + $0x20] sm:$0xff] (%p1866_p3)  ;;  %v389_v5 = vld [vmem:[%s1923_s17 + $0x28] sm:$0xff] (%p1866_p3) }
  0x2a   : > { %380 = vst [vmem:[%s1928_s1] sm:$0xff] %v379_v0  ;;  %v391_v6 = vld [vmem:[%s1923_s17 + $0x30] sm:$0xff]  ;;  %v393_v7 = vld [vmem:[%s1923_s17 + $0x38] sm:$0xff]  ;;  %v395_v8 = vld [vmem:[%s1923_s17 + $0x40] sm:$0xff] }
  0x2b   : > { %382 = vst [vmem:[%s1928_s1 + $0x8] sm:$0xff] %v381_v1  ;;  %v397_v9 = vld [vmem:[%s1923_s17 + $0x48] sm:$0xff]  ;;  %v399_v10 = vld [vmem:[%s1923_s17 + $0x50] sm:$0xff]  ;;  %v401_v11 = vld [vmem:[%s1923_s17 + $0x58] sm:$0xff] }
  0x2c   : > { %384 = vst [vmem:[%s1928_s1 + $0x10] sm:$0xff] %v383_v2  ;;  %v403_v12 = vld [vmem:[%s1923_s17 + $0x60] sm:$0xff]  ;;  %v405_v13 = vld [vmem:[%s1923_s17 + $0x68] sm:$0xff]  ;;  %v407_v14 = vld [vmem:[%s1923_s17 + $0x70] sm:$0xff] }
  0x2d   : > { %386 = vst [vmem:[%s1928_s1 + $0x18] sm:$0xff] %v385_v3  ;;  %v409_v15 = vld [vmem:[%s1923_s17 + $0x78] sm:$0xff]  ;;  %v411_v16 = vld [vmem:[%s1923_s17 + $0x100] sm:$0xff]  ;;  %v413_v17 = vld [vmem:[%s1923_s17 + $0x108] sm:$0xff] }
  0x2e   : > { %388 = vst [vmem:[%s1928_s1 + $0x20] sm:$0xff] %v387_v4  ;;  %v415_v18 = vld [vmem:[%s1923_s17 + $0x110] sm:$0xff]  ;;  %v417_v19 = vld [vmem:[%s1923_s17 + $0x118] sm:$0xff]  ;;  %v419_v20 = vld [vmem:[%s1923_s17 + $0x120] sm:$0xff] }
  0x2f   : > { %390 = vst [vmem:[%s1928_s1 + $0x28] sm:$0xff] %v389_v5  ;;  %v421_v21 = vld [vmem:[%s1923_s17 + $0x128] sm:$0xff]  ;;  %v423_v22 = vld [vmem:[%s1923_s17 + $0x130] sm:$0xff]  ;;  %v425_v23 = vld [vmem:[%s1923_s17 + $0x138] sm:$0xff] }
  0x30   : > { %392 = vst [vmem:[%s1928_s1 + $0x30] sm:$0xff] %v391_v6  ;;  %v427_v24 = vld [vmem:[%s1923_s17 + $0x140] sm:$0xff]  ;;  %v429_v25 = vld [vmem:[%s1923_s17 + $0x148] sm:$0xff]  ;;  %v431_v26 = vld [vmem:[%s1923_s17 + $0x150] sm:$0xff] }
  0x31   : > { %394 = vst [vmem:[%s1928_s1 + $0x38] sm:$0xff] %v393_v7  ;;  %v433_v27 = vld [vmem:[%s1923_s17 + $0x158] sm:$0xff]  ;;  %v435_v28 = vld [vmem:[%s1923_s17 + $0x160] sm:$0xff]  ;;  %v437_v29 = vld [vmem:[%s1923_s17 + $0x168] sm:$0xff] }
  0x32   : > { %396 = vst [vmem:[%s1928_s1 + $0x40] sm:$0xff] %v395_v8  ;;  %v439_v30 = vld [vmem:[%s1923_s17 + $0x170] sm:$0xff]  ;;  %v441_v31 = vld [vmem:[%s1923_s17 + $0x178] sm:$0xff]  ;;  %v443_v32 = vld [vmem:[%s1923_s17 + $0x200] sm:$0xff] }
  0x33   : > { %398 = vst [vmem:[%s1928_s1 + $0x48] sm:$0xff] %v397_v9  ;;  %v445_v33 = vld [vmem:[%s1923_s17 + $0x208] sm:$0xff]  ;;  %v447_v34 = vld [vmem:[%s1923_s17 + $0x210] sm:$0xff]  ;;  %v449_v35 = vld [vmem:[%s1923_s17 + $0x218] sm:$0xff] }
  0x34   : > { %400 = vst [vmem:[%s1928_s1 + $0x50] sm:$0xff] %v399_v10  ;;  %v451_v36 = vld [vmem:[%s1923_s17 + $0x220] sm:$0xff]  ;;  %v453_v37 = vld [vmem:[%s1923_s17 + $0x228] sm:$0xff]  ;;  %v455_v38 = vld [vmem:[%s1923_s17 + $0x230] sm:$0xff] }
  0x35   : > { %402 = vst [vmem:[%s1928_s1 + $0x58] sm:$0xff] %v401_v11  ;;  %v457_v39 = vld [vmem:[%s1923_s17 + $0x238] sm:$0xff]  ;;  %v459_v40 = vld [vmem:[%s1923_s17 + $0x240] sm:$0xff]  ;;  %v461_v41 = vld [vmem:[%s1923_s17 + $0x248] sm:$0xff] }
  0x36   : > { %404 = vst [vmem:[%s1928_s1 + $0x60] sm:$0xff] %v403_v12  ;;  %v463_v42 = vld [vmem:[%s1923_s17 + $0x250] sm:$0xff]  ;;  %v465_v43 = vld [vmem:[%s1923_s17 + $0x258] sm:$0xff]  ;;  %v467_v44 = vld [vmem:[%s1923_s17 + $0x260] sm:$0xff] }
  0x37   : > { %406 = vst [vmem:[%s1928_s1 + $0x68] sm:$0xff] %v405_v13  ;;  %v469_v45 = vld [vmem:[%s1923_s17 + $0x268] sm:$0xff]  ;;  %v471_v46 = vld [vmem:[%s1923_s17 + $0x270] sm:$0xff]  ;;  %v473_v47 = vld [vmem:[%s1923_s17 + $0x278] sm:$0xff] }
  0x38   : > { %408 = vst [vmem:[%s1928_s1 + $0x70] sm:$0xff] %v407_v14 }
  0x39   : > { %410 = vst [vmem:[%s1928_s1 + $0x78] sm:$0xff] %v409_v15 }
  0x3a   : > { %412 = vst [vmem:[%s1928_s1 + $0x80] sm:$0xff] %v411_v16 }
  0x3b   : > { %414 = vst [vmem:[%s1928_s1 + $0x88] sm:$0xff] %v413_v17 }
  0x3c   : > { %416 = vst [vmem:[%s1928_s1 + $0x90] sm:$0xff] %v415_v18 }
  0x3d   : > { %418 = vst [vmem:[%s1928_s1 + $0x98] sm:$0xff] %v417_v19 }
  0x3e   : > { %420 = vst [vmem:[%s1928_s1 + $0xa0] sm:$0xff] %v419_v20 }
  0x3f   : > { %422 = vst [vmem:[%s1928_s1 + $0xa8] sm:$0xff] %v421_v21 }
  0x40   : > { %424 = vst [vmem:[%s1928_s1 + $0xb0] sm:$0xff] %v423_v22 }
  0x41   : > { %426 = vst [vmem:[%s1928_s1 + $0xb8] sm:$0xff] %v425_v23 }
  0x42   : > { %428 = vst [vmem:[%s1928_s1 + $0xc0] sm:$0xff] %v427_v24 }
  0x43   : > { %430 = vst [vmem:[%s1928_s1 + $0xc8] sm:$0xff] %v429_v25 }
  0x44   : > { %432 = vst [vmem:[%s1928_s1 + $0xd0] sm:$0xff] %v431_v26 }
  0x45   : > { %434 = vst [vmem:[%s1928_s1 + $0xd8] sm:$0xff] %v433_v27 }
  0x46   : > { %436 = vst [vmem:[%s1928_s1 + $0xe0] sm:$0xff] %v435_v28 }
  0x47   : > { %438 = vst [vmem:[%s1928_s1 + $0xe8] sm:$0xff] %v437_v29 }
  0x48   : > { %440 = vst [vmem:[%s1928_s1 + $0xf0] sm:$0xff] %v439_v30 }
  0x49   : > { %442 = vst [vmem:[%s1928_s1 + $0xf8] sm:$0xff] %v441_v31 }
  0x4a   : > { %444 = vst [vmem:[%s1928_s1 + $0x100] sm:$0xff] %v443_v32 }
  0x4b   : > { %446 = vst [vmem:[%s1928_s1 + $0x108] sm:$0xff] %v445_v33 }
  0x4c   : > { %448 = vst [vmem:[%s1928_s1 + $0x110] sm:$0xff] %v447_v34 }
  0x4d   : > { %450 = vst [vmem:[%s1928_s1 + $0x118] sm:$0xff] %v449_v35 }
  0x4e   : > { %452 = vst [vmem:[%s1928_s1 + $0x120] sm:$0xff] %v451_v36 }
  0x4f   : > { %454 = vst [vmem:[%s1928_s1 + $0x128] sm:$0xff] %v453_v37 }
  0x50   : > { %456 = vst [vmem:[%s1928_s1 + $0x130] sm:$0xff] %v455_v38 }
  0x51   : > { %458 = vst [vmem:[%s1928_s1 + $0x138] sm:$0xff] %v457_v39 }
  0x52   : > { %460 = vst [vmem:[%s1928_s1 + $0x140] sm:$0xff] %v459_v40 }
  0x53   : > { %462 = vst [vmem:[%s1928_s1 + $0x148] sm:$0xff] %v461_v41 }
  0x54   : > { %464 = vst [vmem:[%s1928_s1 + $0x150] sm:$0xff] %v463_v42 }
  0x55   : > { %466 = vst [vmem:[%s1928_s1 + $0x158] sm:$0xff] %v465_v43 }
  0x56   : > { %468 = vst [vmem:[%s1928_s1 + $0x160] sm:$0xff] %v467_v44 }
  0x57   : > { %470 = vst [vmem:[%s1928_s1 + $0x168] sm:$0xff] %v469_v45 }
  0x58   : > { %472 = vst [vmem:[%s1928_s1 + $0x170] sm:$0xff] %v471_v46 }
  0x59   : > { %474 = vst [vmem:[%s1928_s1 + $0x178] sm:$0xff] %v473_v47 }
  0x5a PF: > { %483 = sbr.rel (%p1899_p2) target bundleno = 376 (0x178), region = 70  ;;  %s2026_s20 = sand.u32 (!%p1899_p2), 1, %s1755_s16  }
  0x5b   : > { %s1326_s21 = sshll.u32 (!%p1899_p2), %s2026_s20, 7  ;;  %s486_s25 = scalar_lea.sflag (!%p1899_p2), [#allocation3], %s2026_s20 }
  0x5c   : > { %s2030_s26 = scalar_lea.vmem (!%p1899_p2), [#allocation2], %s1326_s21 }
  0x5f   : > { %1738 = dma.done.wait (%p1880_p9), %s486_s25, 2048  }
  0x60   : > { %1740 = vsyncadd (%p1880_p9), %s486_s25, 4294965248 }
  0x61   : > { %1742 = dma.done.wait (%p1872_p6), [#allocation6], 2048  }
  0x62   : > { %1744 = vsyncadd (%p1872_p6), [#allocation6], 4294965248  ;;  %s1523_s17 = smul.u32 384, %s2026_s20  ;;  %s1329_s28 = sshll.u32 %s1767_s19, 4 }
  0x63   : > { %p549_p3 = scmp.lt.s32.totalorder %s1763_s18, 2  ;;  %p551_p7 = scmp.lt.s32.totalorder %s1329_s28, 31 }
  0x64   : > { %p566_p8 = scmp.eq.s32.totalorder %s1763_s18, 0  ;;  %s503_s13 = scalar_lea.vmem [#allocation7], %s1523_s17 }
  0x65   : > { %s550_s8 = scalar_select %p549_p3, %s1763_s18, 2  ;;  %v1786_v48 = vmov (%p566_p8), 0.0  }
  0x66   : > { %s2296_s28 = smov (!%p551_p7, %s1329_s28), 31  ;;  %s2050_s12 = scalar_lea.vmem [#allocation8], %s1326_s21 }
  0x67   : > { %s1331_s9 = sshll.u32 %s550_s8, 6  ;;  %s1330_s30 = sshll.u32 %s2296_s28, 1  ;;  %571 = vst [vmem:[%s2050_s12] sm:$0xff] (%p566_p8), %v1786_v48 }
  0x68   : > { %s558_s27 = sadd.s32 %s1331_s9, %s1330_s30  ;;  %570 = sbr.rel (!%p566_p8) target bundleno = 119 (0x77), region = 86  ;;  %572 = vst [vmem:[%s2050_s12 + $0x8] sm:$0xff] (%p566_p8), %v1786_v48 }
  0x69   : > { %s1332_s6 = sshll.u32 %s558_s27, 2  ;;  %573 = vst [vmem:[%s2050_s12 + $0x10] sm:$0xff] (%p566_p8), %v1786_v48 }
  0x6a   : > { %s2048_s29 = scalar_lea.vmem %s2260_s2, %s1332_s6  ;;  %574 = vst [vmem:[%s2050_s12 + $0x18] sm:$0xff] (%p566_p8), %v1786_v48 }
  0x6b   : > { %575 = vst [vmem:[%s2050_s12 + $0x20] sm:$0xff] (%p566_p8), %v1786_v48 }
  0x6c   : > { %576 = vst [vmem:[%s2050_s12 + $0x28] sm:$0xff] (%p566_p8), %v1786_v48 }
  0x6d   : > { %577 = vst [vmem:[%s2050_s12 + $0x30] sm:$0xff] %v1786_v48 }
  0x6e   : > { %578 = vst [vmem:[%s2050_s12 + $0x38] sm:$0xff] %v1786_v48 }
  0x6f   : > { %579 = vst [vmem:[%s2050_s12 + $0x40] sm:$0xff] %v1786_v48 }
  0x70   : > { %580 = vst [vmem:[%s2050_s12 + $0x48] sm:$0xff] %v1786_v48 }
  0x71   : > { %581 = vst [vmem:[%s2050_s12 + $0x50] sm:$0xff] %v1786_v48 }
  0x72   : > { %582 = vst [vmem:[%s2050_s12 + $0x58] sm:$0xff] %v1786_v48 }
  0x73   : > { %583 = vst [vmem:[%s2050_s12 + $0x60] sm:$0xff] %v1786_v48 }
  0x74   : > { %584 = vst [vmem:[%s2050_s12 + $0x68] sm:$0xff] %v1786_v48 }
  0x75   : > { %585 = vst [vmem:[%s2050_s12 + $0x70] sm:$0xff] %v1786_v48 }
  0x76   : > { %586 = vst [vmem:[%s2050_s12 + $0x78] sm:$0xff] %v1786_v48 }
  0x77 PF: > { %v1495_v49 = vld [vmem:[#allocation5 + $0x38] sm:$0xff]  ;;  %s1462_s14 = sshll.u32 %s1763_s18, 7  ;;  %v1787_v51 = vmov 0   ;;  %v1494_v52 = vld [vmem:[#allocation5 + $0x30] sm:$0xff]  ;;  %v1493_v55 = vld [vmem:[#allocation5 + $0x28] sm:$0xff]  ;;  %p1071_p6 = scmp.eq.s32.totalorder %s1763_s18, 2 }
  0x78   : > { %v1503_v50 = vld [vmem:[#allocation5 + $0x78] sm:$0xff]  ;;  %1616 = vset.pattern.permute.xlu0 %v1787_v51  ;;  %s2069_s23 = scalar_lea.vmem %s503_s13, %s1462_s14 [#allocation7]  ;;  %1617 = vset.pattern.permute.xlu1 %v1787_v51  ;;  %v1502_v53 = vld [vmem:[#allocation5 + $0x70] sm:$0xff]  ;;  %v1501_v56 = vld [vmem:[#allocation5 + $0x68] sm:$0xff] }
  0x79   : > { %811 = vmatpush.bf16.msra.mxu0 %v1495_v49  ;;  %1506 = vmatpush.bf16.msra.mxu2 %v1495_v49  ;;  %v927_v54 = vld [vmem:[%s2069_s23] sm:$0xff]  ;;  %v929_v57 = vld [vmem:[%s2069_s23 + $0x10] sm:$0xff]  ;;  %v928_v59 = vld [vmem:[%s2069_s23 + $0x8] sm:$0xff] }
  0x7a   : > { %860 = vmatpush.bf16.msra.mxu1 %v1503_v50  ;;  %1514 = vmatpush.bf16.msra.mxu3 %v1503_v50  ;;  %v1492_v58 = vld [vmem:[#allocation5 + $0x20] sm:$0xff]  ;;  %v1491_v61 = vld [vmem:[#allocation5 + $0x18] sm:$0xff]  ;;  %v1490_v63 = vld [vmem:[#allocation5 + $0x10] sm:$0xff] }
  0x7b   : > { %1618 = vset.pattern.permute.xlu2 %v1787_v51  ;;  %945 = vperm.xlu0 %1616, %v927_v54   ;;  %v1500_v60 = vld [vmem:[#allocation5 + $0x60] sm:$0xff]  ;;  %v1499_v62 = vld [vmem:[#allocation5 + $0x58] sm:$0xff]  ;;  %v933_v0 = vld [vmem:[%s2069_s23 + $0x30] sm:$0xff] }
  0x7c   : > { %955 = vperm.xlu1 %1617, %v929_v57   ;;  %v930_v1 = vld [vmem:[%s2069_s23 + $0x18] sm:$0xff]  ;;  %v931_v2 = vld [vmem:[%s2069_s23 + $0x20] sm:$0xff]  ;;  %v1498_v3 = vld [vmem:[#allocation5 + $0x50] sm:$0xff] }
  0x7d   : > { %812 = vmatpush.bf16.msra.mxu0 %v1494_v52  ;;  %1507 = vmatpush.bf16.msra.mxu2 %v1494_v52  ;;  %v1489_v4 = vld [vmem:[#allocation5 + $0x8] sm:$0xff]  ;;  %v1488_v6 = vld [vmem:[#allocation5] sm:$0xff]  ;;  %v934_v11 = vld [vmem:[%s2069_s23 + $0x38] sm:$0xff] }
  0x7e   : > { %861 = vmatpush.bf16.msra.mxu1 %v1502_v53  ;;  %1515 = vmatpush.bf16.msra.mxu3 %v1502_v53  ;;  %v1497_v5 = vld [vmem:[#allocation5 + $0x48] sm:$0xff]  ;;  %v1336_v7 = vld [vmem:[%s2048_s29] sm:$0xf]  ;;  %v1472_v13 = vld [vmem:[%s2048_s29 + $0x4] sm:$0xf] }
  0x7f   : > { %965 = vperm.xlu2 %1618, %v931_v2   ;;  %v1496_v8 = vld [vmem:[#allocation5 + $0x40] sm:$0xff]  ;;  %v1473_v9 = vld [vmem:[%s2048_s29 + $0x4] sm:$0xf0]  ;;  %v1338_v15 = vld [vmem:[%s2048_s29 + $0x8] sm:$0xf0] }
  0x80   : > { %v1368_v10 = vld [vmem:[%s2048_s29 + $0x40] sm:$0xf]  ;;  %v1481_v12 = vld [vmem:[%s2048_s29 + $0x44] sm:$0xf0]  ;;  %v1480_v16 = vld [vmem:[%s2048_s29 + $0x44] sm:$0xf]  ;;  %v1337_v18 = vor.u32 %v1473_v9, %v1336_v7  ;;  %v1341_v20 = vor.u32 %v1472_v13, %v1338_v15 }
  0x81   : > { %813 = vmatpush.bf16.msra.mxu0 %v1493_v55  ;;  %1508 = vmatpush.bf16.msra.mxu2 %v1493_v55  ;;  %v936_v14 = vld [vmem:[%s2069_s23 + $0x48] sm:$0xff]  ;;  %v1369_v19 = vor.u32 %v1481_v12, %v1368_v10  ;;  %v939_v22 = vld [vmem:[%s2069_s23 + $0x60] sm:$0xff]  ;;  %v937_v24 = vld [vmem:[%s2069_s23 + $0x50] sm:$0xff] }
  0x82   : > { %862 = vmatpush.bf16.msra.mxu1 %v1501_v56  ;;  %1516 = vmatpush.bf16.msra.mxu3 %v1501_v56  ;;  %v1370_v17 = vld [vmem:[%s2048_s29 + $0x48] sm:$0xf0]  ;;  %v1344_v25 = vld [vmem:[%s2048_s29 + $0x10] sm:$0xf]  ;;  %v935_v26 = vld [vmem:[%s2069_s23 + $0x40] sm:$0xff] }
  0x83   : > { %950 = vperm.xlu0 %1616, %v928_v59   ;;  %v1373_v21 = vor.u32 %v1480_v16, %v1370_v17  ;;  %v932_v23 = vld [vmem:[%s2069_s23 + $0x28] sm:$0xff]  ;;  %v1475_v27 = vld [vmem:[%s2048_s29 + $0x14] sm:$0xf0]  ;;  %v1376_v28 = vld [vmem:[%s2048_s29 + $0x50] sm:$0xf] }
  0x84   : > { %960 = vperm.xlu1 %1617, %v930_v1   ;;  %v940_v29 = vld [vmem:[%s2069_s23 + $0x68] sm:$0xff]  ;;  %v1483_v30 = vld [vmem:[%s2048_s29 + $0x54] sm:$0xf0]  ;;  %v1474_v31 = vld [vmem:[%s2048_s29 + $0x14] sm:$0xf]  ;;  %v1345_v36 = vor.u32 %v1475_v27, %v1344_v25 }
  0x85   : > { %814 = vmatpush.bf16.msra.mxu0 %v1492_v58  ;;  %1509 = vmatpush.bf16.msra.mxu2 %v1492_v58  ;;  %v942_v32 = vld [vmem:[%s2069_s23 + $0x78] sm:$0xff]  ;;  %v1482_v34 = vld [vmem:[%s2048_s29 + $0x54] sm:$0xf]  ;;  %v1377_v37 = vor.u32 %v1483_v30, %v1376_v28  ;;  %v1352_v42 = vld [vmem:[%s2048_s29 + $0x20] sm:$0xf] }
  0x86   : > { %863 = vmatpush.bf16.msra.mxu1 %v1500_v60  ;;  %1517 = vmatpush.bf16.msra.mxu3 %v1500_v60  ;;  %v1346_v33 = vld [vmem:[%s2048_s29 + $0x18] sm:$0xf0]  ;;  %v941_v41 = vld [vmem:[%s2069_s23 + $0x70] sm:$0xff]  ;;  %v1477_v43 = vld [vmem:[%s2048_s29 + $0x24] sm:$0xf0] }
  0x87   : > { %970 = vperm.xlu2 %1618, %v932_v23   ;;  %v1378_v35 = vld [vmem:[%s2048_s29 + $0x58] sm:$0xf0]  ;;  %v1349_v38 = vor.u32 %v1474_v31, %v1346_v33  ;;  %v1384_v44 = vld [vmem:[%s2048_s29 + $0x60] sm:$0xf]  ;;  %v1485_v45 = vld [vmem:[%s2048_s29 + $0x64] sm:$0xf0]  ;;  %v1353_v50 = vor.u32 %v1477_v43, %v1352_v42 }
  0x88   : > { %v1381_v39 = vor.u32 %v1482_v34, %v1378_v35  ;;  %v938_v40 = vld [vmem:[%s2069_s23 + $0x58] sm:$0xff]  ;;  %v1476_v46 = vld [vmem:[%s2048_s29 + $0x24] sm:$0xf]  ;;  %v1354_v47 = vld [vmem:[%s2048_s29 + $0x28] sm:$0xf0]  ;;  %v1385_v51 = vor.u32 %v1485_v45, %v1384_v44 }
  0x89   : > { %815 = vmatpush.bf16.msra.mxu0 %v1491_v61  ;;  %1510 = vmatpush.bf16.msra.mxu2 %v1491_v61  ;;  %v1484_v48 = vld [vmem:[%s2048_s29 + $0x64] sm:$0xf]  ;;  %v1386_v49 = vld [vmem:[%s2048_s29 + $0x68] sm:$0xf0]  ;;  %v1357_v52 = vor.u32 %v1476_v46, %v1354_v47  ;;  %v1360_v54 = vld [vmem:[%s2048_s29 + $0x30] sm:$0xf] }
  0x8a   : > { %864 = vmatpush.bf16.msra.mxu1 %v1499_v62  ;;  %1518 = vmatpush.bf16.msra.mxu3 %v1499_v62  ;;  %v1389_v53 = vor.u32 %v1484_v48, %v1386_v49  ;;  %v1479_v55 = vld [vmem:[%s2048_s29 + $0x34] sm:$0xf0]  ;;  %v1392_v56 = vld [vmem:[%s2048_s29 + $0x70] sm:$0xf]  ;;  %v1478_v58 = vld [vmem:[%s2048_s29 + $0x34] sm:$0xf] }
  0x8b   : > { %975 = vperm.xlu0 %1616, %v933_v0   ;;  %v1487_v57 = vld [vmem:[%s2048_s29 + $0x74] sm:$0xf0]  ;;  %v1362_v59 = vld [vmem:[%s2048_s29 + $0x38] sm:$0xf0]  ;;  %v1486_v60 = vld [vmem:[%s2048_s29 + $0x74] sm:$0xf]  ;;  %v1361_v62 = vor.u32 %v1479_v55, %v1360_v54 }
  0x8c   : > { %980 = vperm.xlu1 %1617, %v934_v11   ;;  %v1394_v61 = vld [vmem:[%s2048_s29 + $0x78] sm:$0xf0]  ;;  %v1365_v0 = vor.u32 %v1478_v58, %v1362_v59  ;;  %v909_v10 = vld [vmem:[%s2050_s12] sm:$0xff]  ;;  %v918_v34 = vld [vmem:[%s2050_s12 + $0x48] sm:$0xff] }
  0x8d   : > { %816 = vmatpush.bf16.msra.mxu0 %v1490_v63  ;;  %1511 = vmatpush.bf16.msra.mxu2 %v1490_v63  ;;  %v1393_v63 = vor.u32 %v1487_v57, %v1392_v56  ;;  %v1397_v1 = vor.u32 %v1486_v60, %v1394_v61  ;;  %v919_v47 = vld [vmem:[%s2050_s12 + $0x50] sm:$0xff]  ;;  %v920_v60 = vld [vmem:[%s2050_s12 + $0x58] sm:$0xff] }
  0x8e   : > { %865 = vmatpush.bf16.msra.mxu1 %v1498_v3  ;;  %1519 = vmatpush.bf16.msra.mxu3 %v1498_v3 }
  0x8f   : > { %985 = vperm.xlu2 %1618, %v935_v26  }
  0x91   : > { %817 = vmatpush.bf16.msra.mxu0 %v1489_v4  ;;  %1512 = vmatpush.bf16.msra.mxu2 %v1489_v4 }
  0x92   : > { %866 = vmatpush.bf16.msra.mxu1 %v1497_v5  ;;  %1520 = vmatpush.bf16.msra.mxu3 %v1497_v5 }
  0x93   : > { %990 = vperm.xlu0 %1616, %v936_v14  }
  0x94   : > { %995 = vperm.xlu1 %1617, %v937_v24   ;;  %v910_v24 = vld [vmem:[%s2050_s12 + $0x8] sm:$0xff] }
  0x95   : > { %818 = vmatpush.bf16.msra.mxu0 %v1488_v6  ;;  %1513 = vmatpush.bf16.msra.mxu2 %v1488_v6 }
  0x96   : > { %867 = vmatpush.bf16.msra.mxu1 %v1496_v8  ;;  %1521 = vmatpush.bf16.msra.mxu3 %v1496_v8 }
  0x97   : > { %1000 = vperm.xlu2 %1618, %v938_v40  }
  0x98   : > { %819 = vmatmul.bf16.vlgmr.msra.gmra.mxu0 %v1337_v18  ;;  %839 = vmatmul.bf16.vlgmr.msra.gmra.mxu2 %v1369_v19 }
  0x99   : > { %868 = vmatmul.bf16.vlgmr.msra.gmra.mxu1 %v1341_v20  ;;  %888 = vmatmul.bf16.vlgmr.msra.gmra.mxu3 %v1373_v21  ;;  %v917_v20 = vld [vmem:[%s2050_s12 + $0x40] sm:$0xff] }
  0x9b   : > { %1005 = vperm.xlu0 %1616, %v939_v22  }
  0x9c   : > { %1010 = vperm.xlu1 %1617, %v940_v29  }
  0x9f   : > { %1015 = vperm.xlu2 %1618, %v941_v41  }
  0xa3   : > { %1020 = vperm.xlu0 %1616, %v942_v32  }
  0xa8   : > { %824 = vmatmul.bf16.gmra.mxu0 %v1345_v36  ;;  %844 = vmatmul.bf16.gmra.mxu2 %v1377_v37 }
  0xa9   : > { %873 = vmatmul.bf16.gmra.mxu1 %v1349_v38  ;;  %893 = vmatmul.bf16.gmra.mxu3 %v1381_v39  ;;  %v911_v38 = vld [vmem:[%s2050_s12 + $0x10] sm:$0xff] }
  0xb8   : > { %829 = vmatmul.bf16.gmra.mxu0 %v1353_v50  ;;  %849 = vmatmul.bf16.gmra.mxu2 %v1385_v51  ;;  %v912_v51 = vld [vmem:[%s2050_s12 + $0x18] sm:$0xff] }
  0xb9   : > { %878 = vmatmul.bf16.gmra.mxu1 %v1357_v52  ;;  %898 = vmatmul.bf16.gmra.mxu3 %v1389_v53 }
  0xc8   : > { %834 = vmatmul.bf16.gmra.mxu0 %v1361_v62  ;;  %854 = vmatmul.bf16.gmra.mxu2 %v1393_v63 }
  0xc9   : > { %883 = vmatmul.bf16.gmra.mxu1 %v1365_v0  ;;  %903 = vmatmul.bf16.gmra.mxu3 %v1397_v1  ;;  %v913_v0 = vld [vmem:[%s2050_s12 + $0x20] sm:$0xff] }
  0xd9   : > { %v2120_v2 = vpop.permute.xlu2 %965 }
  0xe1   : > { %v2122_v5 = vpop.permute.xlu2 %970 }
  0xe9   : > { %v986_v15 = vpop.permute.xlu2 %985 }
  0xed   : > { %v946_v3 = vpop.permute.xlu0 %945 }
  0xee   : > { %v956_v4 = vpop.permute.xlu1 %955 }
  0xf1   : > { %v1001_v59 = vpop.permute.xlu2 %1000 }
  0xf5   : > { %v951_v6 = vpop.permute.xlu0 %950 }
  0xf6   : > { %v961_v11 = vpop.permute.xlu1 %960 }
  0xfd   : > { %v2125_v16 = vpop.permute.xlu0 %975 }
  0xfe   : > { %v2130_v27 = vpop.permute.xlu1 %980 }
 0x105   : > { %v991_v33 = vpop.permute.xlu0 %990 }
 0x106   : > { %v996_v44 = vpop.permute.xlu1 %995 }
 0x115   : > { %v820_v7 = vpop.f32.mrf.mxu0 }
 0x116   : > { %v869_v8 = vpop.f32.mrf.mxu1 }
 0x117   : > { %v870_v9 = vadd.f32 %v869_v8, %v820_v7 }
 0x119   : > { %v1023_v12 = vmul.f32 %v946_v3, %v870_v9 }
 0x11b   : > { %v1039_v13 = vadd.f32 %v1023_v12, %v909_v10  ;;  %v840_v14 = vpop.f32.mrf.mxu2  ;;  %v1006_v10 = vpop.permute.xlu0 %1005 }
 0x11c   : > { %v889_v17 = vpop.f32.mrf.mxu3 }
 0x11d   : > { %1055 = vst [vmem:[%s2050_s12] sm:$0xff] %v1039_v13  ;;  %v890_v18 = vadd.f32 %v889_v17, %v840_v14  ;;  %v822_v19 = vpop.f32.mrf.mxu0 }
 0x11e   : > { %v871_v21 = vpop.f32.mrf.mxu1 }
 0x11f   : > { %v1031_v22 = vmul.f32 %v986_v15, %v890_v18  ;;  %v872_v23 = vadd.f32 %v871_v21, %v822_v19  ;;  %v914_v15 = vld [vmem:[%s2050_s12 + $0x28] sm:$0xff] }
 0x121   : > { %v1047_v25 = vadd.f32 %v1031_v22, %v917_v20  ;;  %v1024_v26 = vmul.f32 %v951_v6, %v872_v23  ;;  %v1011_v23 = vpop.permute.xlu1 %1010 }
 0x123   : > { %1063 = vst [vmem:[%s2050_s12 + $0x40] sm:$0xff] %v1047_v25  ;;  %v1040_v28 = vadd.f32 %v1024_v26, %v910_v24  ;;  %v842_v29 = vpop.f32.mrf.mxu2  ;;  %v922_v24 = vld [vmem:[%s2050_s12 + $0x68] sm:$0xff] }
 0x124   : > { %v891_v30 = vpop.f32.mrf.mxu3 }
 0x125   : > { %1056 = vst [vmem:[%s2050_s12 + $0x8] sm:$0xff] %v1040_v28  ;;  %v892_v31 = vadd.f32 %v891_v30, %v842_v29  ;;  %v825_v32 = vpop.f32.mrf.mxu0  ;;  %v915_v29 = vld [vmem:[%s2050_s12 + $0x30] sm:$0xff] }
 0x126   : > { %v874_v35 = vpop.f32.mrf.mxu1 }
 0x127   : > { %v1032_v36 = vmul.f32 %v991_v33, %v892_v31  ;;  %v875_v37 = vadd.f32 %v874_v35, %v825_v32 }
 0x129   : > { %v1048_v39 = vadd.f32 %v1032_v36, %v918_v34  ;;  %v1025_v40 = vmul.f32 %v956_v4, %v875_v37  ;;  %v1016_v36 = vpop.permute.xlu2 %1015  ;;  %v923_v37 = vld [vmem:[%s2050_s12 + $0x70] sm:$0xff] }
 0x12b   : > { %1064 = vst [vmem:[%s2050_s12 + $0x48] sm:$0xff] %v1048_v39  ;;  %v1041_v41 = vadd.f32 %v1025_v40, %v911_v38  ;;  %v845_v42 = vpop.f32.mrf.mxu2 }
 0x12c   : > { %v894_v43 = vpop.f32.mrf.mxu3 }
 0x12d   : > { %1057 = vst [vmem:[%s2050_s12 + $0x10] sm:$0xff] %v1041_v41  ;;  %v895_v45 = vadd.f32 %v894_v43, %v845_v42  ;;  %v827_v46 = vpop.f32.mrf.mxu0  ;;  %v916_v41 = vld [vmem:[%s2050_s12 + $0x38] sm:$0xff] }
 0x12e   : > { %v876_v48 = vpop.f32.mrf.mxu1 }
 0x12f   : > { %v1033_v49 = vmul.f32 %v996_v44, %v895_v45  ;;  %v877_v50 = vadd.f32 %v876_v48, %v827_v46  ;;  %v924_v48 = vld [vmem:[%s2050_s12 + $0x78] sm:$0xff] }
 0x131   : > { %v1049_v52 = vadd.f32 %v1033_v49, %v919_v47  ;;  %v1026_v53 = vmul.f32 %v961_v11, %v877_v50  ;;  %v921_v11 = vld [vmem:[%s2050_s12 + $0x60] sm:$0xff]  ;;  %v1021_v47 = vpop.permute.xlu0 %1020 }
 0x133   : > { %1065 = vst [vmem:[%s2050_s12 + $0x50] sm:$0xff] %v1049_v52  ;;  %v1042_v54 = vadd.f32 %v1026_v53, %v912_v51  ;;  %v847_v55 = vpop.f32.mrf.mxu2  ;;  %v1108_v51 = vld [vmem:[%s2030_s26] sm:$0xff] (%p1071_p6)  ;;  %v1077_v52 = vld [vmem:[%s2050_s12 + $0x8] sm:$0xff] (%p1071_p6) }
 0x134   : > { %v896_v56 = vpop.f32.mrf.mxu3 }
 0x135   : > { %1058 = vst [vmem:[%s2050_s12 + $0x18] sm:$0xff] %v1042_v54  ;;  %v897_v57 = vadd.f32 %v896_v56, %v847_v55  ;;  %v830_v58 = vpop.f32.mrf.mxu0  ;;  %v1093_v54 = vmul.f32 (%p1071_p6), 0.33333334, %v1077_v52  ;;  %v1109_v55 = vld [vmem:[%s2030_s26 + $0x8] sm:$0xff] (%p1071_p6)  ;;  %v1078_v56 = vld [vmem:[%s2050_s12 + $0x10] sm:$0xff] (%p1071_p6) }
 0x136   : > { %v879_v61 = vpop.f32.mrf.mxu1 }
 0x137   : > { %v1034_v62 = vmul.f32 %v1001_v59, %v897_v57  ;;  %v880_v63 = vadd.f32 %v879_v61, %v830_v58  ;;  %v1094_v57 = vmul.f32 (%p1071_p6), 0.33333334, %v1078_v56  ;;  %v1110_v58 = vld [vmem:[%s2030_s26 + $0x10] sm:$0xff] (%p1071_p6) }
 0x139   : > { %v1050_v1 = vadd.f32 %v1034_v62, %v920_v60  ;;  %v1027_v3 = vmul.f32 %v2120_v2, %v880_v63  ;;  %v1111_v60 = vld [vmem:[%s2030_s26 + $0x18] sm:$0xff] (%p1071_p6)  ;;  %v1125_v62 = vadd.f32 (%p1071_p6), %v1109_v55, %v1093_v54 }
 0x13b   : > { %1066 = vst [vmem:[%s2050_s12 + $0x58] sm:$0xff] %v1050_v1  ;;  %v1043_v4 = vadd.f32 %v1027_v3, %v913_v0  ;;  %v850_v6 = vpop.f32.mrf.mxu2  ;;  %v1112_v1 = vld [vmem:[%s2030_s26 + $0x20] sm:$0xff] (%p1071_p6) }
 0x13c   : > { %v899_v7 = vpop.f32.mrf.mxu3  ;;  %v1079_v59 = vld [vmem:[%s2050_s12 + $0x18] sm:$0xff] (%p1071_p6)  ;;  %1141 = vst [vmem:[%s2050_s12 + $0x8] sm:$0xff] (%p1071_p6), %v1125_v62 }
 0x13d   : > { %1059 = vst [vmem:[%s2050_s12 + $0x20] sm:$0xff] %v1043_v4  ;;  %v900_v8 = vadd.f32 %v899_v7, %v850_v6  ;;  %v832_v9 = vpop.f32.mrf.mxu0  ;;  %v1095_v63 = vmul.f32 (%p1071_p6), 0.33333334, %v1079_v59  ;;  %v1126_v4 = vadd.f32 (%p1071_p6), %v1110_v58, %v1094_v57 }
 0x13e   : > { %v881_v12 = vpop.f32.mrf.mxu1 }
 0x13f   : > { %v1035_v13 = vmul.f32 %v1006_v10, %v900_v8  ;;  %v882_v14 = vadd.f32 %v881_v12, %v832_v9  ;;  %v1113_v8 = vld [vmem:[%s2030_s26 + $0x28] sm:$0xff] (%p1071_p6)  ;;  %v1127_v10 = vadd.f32 (%p1071_p6), %v1111_v60, %v1095_v63  ;;  %v1114_v12 = vld [vmem:[%s2030_s26 + $0x30] sm:$0xff] (%p1071_p6)  ;;  %1142 = vst [vmem:[%s2050_s12 + $0x10] sm:$0xff] (%p1071_p6), %v1126_v4 }
 0x141   : > { %v1051_v17 = vadd.f32 %v1035_v13, %v921_v11  ;;  %v1028_v2 = vmul.f32 %v2122_v5, %v882_v14  ;;  %v1115_v14 = vld [vmem:[%s2030_s26 + $0x38] sm:$0xff] (%p1071_p6)  ;;  %1143 = vst [vmem:[%s2050_s12 + $0x18] sm:$0xff] (%p1071_p6), %v1127_v10 }
 0x143   : > { %1067 = vst [vmem:[%s2050_s12 + $0x60] sm:$0xff] %v1051_v17  ;;  %v1044_v18 = vadd.f32 %v1028_v2, %v914_v15  ;;  %v852_v19 = vpop.f32.mrf.mxu2 }
 0x144   : > { %v901_v20 = vpop.f32.mrf.mxu3  ;;  %v1080_v0 = vld [vmem:[%s2050_s12 + $0x20] sm:$0xff] (%p1071_p6) }
 0x145   : > { %1060 = vst [vmem:[%s2050_s12 + $0x28] sm:$0xff] %v1044_v18  ;;  %v902_v21 = vadd.f32 %v901_v20, %v852_v19  ;;  %v835_v22 = vpop.f32.mrf.mxu0  ;;  %v1096_v6 = vmul.f32 (%p1071_p6), 0.33333334, %v1080_v0  ;;  %v1084_v18 = vld [vmem:[%s2050_s12 + $0x40] sm:$0xff] (%p1071_p6)  ;;  %v1085_v20 = vld [vmem:[%s2050_s12 + $0x48] sm:$0xff] (%p1071_p6) }
 0x146   : > { %v884_v25 = vpop.f32.mrf.mxu1  ;;  %v1116_v19 = vld [vmem:[%s2030_s26 + $0x40] sm:$0xff] (%p1071_p6) }
 0x147   : > { %v1036_v26 = vmul.f32 %v1011_v23, %v902_v21  ;;  %v885_v28 = vadd.f32 %v884_v25, %v835_v22  ;;  %v1128_v15 = vadd.f32 (%p1071_p6), %v1112_v1, %v1096_v6  ;;  %v1100_v22 = vmul.f32 (%p1071_p6), 0.33333334, %v1084_v18 }
 0x148   : > { %v1101_v23 = vmul.f32 (%p1071_p6), 0.33333334, %v1085_v20 }
 0x149   : > { %v1052_v30 = vadd.f32 %v1036_v26, %v922_v24  ;;  %v1029_v5 = vmul.f32 %v2125_v16, %v885_v28  ;;  %v1117_v24 = vld [vmem:[%s2030_s26 + $0x48] sm:$0xff] (%p1071_p6)  ;;  %v1086_v26 = vld [vmem:[%s2050_s12 + $0x50] sm:$0xff] (%p1071_p6)  ;;  %1144 = vst [vmem:[%s2050_s12 + $0x20] sm:$0xff] (%p1071_p6), %v1128_v15 }
 0x14a   : > { %v1118_v28 = vld [vmem:[%s2030_s26 + $0x50] sm:$0xff] (%p1071_p6) }
 0x14b   : > { %1068 = vst [vmem:[%s2050_s12 + $0x68] sm:$0xff] %v1052_v30  ;;  %v1045_v31 = vadd.f32 %v1029_v5, %v915_v29  ;;  %v855_v32 = vpop.f32.mrf.mxu2  ;;  %v1087_v29 = vld [vmem:[%s2050_s12 + $0x58] sm:$0xff] (%p1071_p6)  ;;  %v1132_v30 = vadd.f32 (%p1071_p6), %v1116_v19, %v1100_v22  ;;  %v1102_v5 = vmul.f32 (%p1071_p6), 0.33333334, %v1086_v26 }
 0x14c   : > { %v904_v33 = vpop.f32.mrf.mxu3  ;;  %v1081_v3 = vld [vmem:[%s2050_s12 + $0x28] sm:$0xff] (%p1071_p6) }
 0x14d   : > { %1061 = vst [vmem:[%s2050_s12 + $0x30] sm:$0xff] %v1045_v31  ;;  %v905_v34 = vadd.f32 %v904_v33, %v855_v32  ;;  %v837_v35 = vpop.f32.mrf.mxu0  ;;  %v1097_v7 = vmul.f32 (%p1071_p6), 0.33333334, %v1081_v3  ;;  %v1103_v31 = vmul.f32 (%p1071_p6), 0.33333334, %v1087_v29  ;;  %v1119_v32 = vld [vmem:[%s2030_s26 + $0x58] sm:$0xff] (%p1071_p6)  ;;  %v1133_v33 = vadd.f32 (%p1071_p6), %v1117_v24, %v1101_v23 }
 0x14e   : > { %v886_v38 = vpop.f32.mrf.mxu1  ;;  %1148 = vst [vmem:[%s2050_s12 + $0x40] sm:$0xff] (%p1071_p6), %v1132_v30 }
 0x14f   : > { %v1037_v39 = vmul.f32 %v1016_v36, %v905_v34  ;;  %v887_v40 = vadd.f32 %v886_v38, %v837_v35  ;;  %v1129_v17 = vadd.f32 (%p1071_p6), %v1113_v8, %v1097_v7  ;;  %v1088_v34 = vld [vmem:[%s2050_s12 + $0x60] sm:$0xff] (%p1071_p6)  ;;  %1149 = vst [vmem:[%s2050_s12 + $0x48] sm:$0xff] (%p1071_p6), %v1133_v33 }
 0x150   : > { %v1120_v35 = vld [vmem:[%s2030_s26 + $0x60] sm:$0xff] (%p1071_p6)  ;;  %v1104_v38 = vmul.f32 (%p1071_p6), 0.33333334, %v1088_v34 }
 0x151   : > { %v1053_v42 = vadd.f32 %v1037_v39, %v923_v37  ;;  %v1030_v16 = vmul.f32 %v2130_v27, %v887_v40  ;;  %v1076_v27 = vld [vmem:[%s2050_s12] sm:$0xff] (%p1071_p6)  ;;  %1145 = vst [vmem:[%s2050_s12 + $0x28] sm:$0xff] (%p1071_p6), %v1129_v17  ;;  %v1134_v37 = vadd.f32 (%p1071_p6), %v1118_v28, %v1102_v5  ;;  %v1121_v40 = vld [vmem:[%s2030_s26 + $0x68] sm:$0xff] (%p1071_p6) }
 0x152   : > { %v1092_v53 = vmul.f32 (%p1071_p6), 0.33333334, %v1076_v27  ;;  %v1089_v36 = vld [vmem:[%s2050_s12 + $0x68] sm:$0xff] (%p1071_p6) }
 0x153   : > { %1069 = vst [vmem:[%s2050_s12 + $0x70] sm:$0xff] %v1053_v42  ;;  %v1046_v43 = vadd.f32 %v1030_v16, %v916_v41  ;;  %v857_v44 = vpop.f32.mrf.mxu2  ;;  %v1105_v39 = vmul.f32 (%p1071_p6), 0.33333334, %v1089_v36  ;;  %v1135_v41 = vadd.f32 (%p1071_p6), %v1119_v32, %v1103_v31  ;;  %v1122_v16 = vld [vmem:[%s2030_s26 + $0x70] sm:$0xff] (%p1071_p6) }
 0x154   : > { %v906_v45 = vpop.f32.mrf.mxu3  ;;  %v1124_v61 = vadd.f32 (%p1071_p6), %v1108_v51, %v1092_v53  ;;  %v1082_v9 = vld [vmem:[%s2050_s12 + $0x30] sm:$0xff] (%p1071_p6)  ;;  %1150 = vst [vmem:[%s2050_s12 + $0x50] sm:$0xff] (%p1071_p6), %v1134_v37 }
 0x155   : > { %1062 = vst [vmem:[%s2050_s12 + $0x38] sm:$0xff] %v1046_v43  ;;  %v907_v46 = vadd.f32 %v906_v45, %v857_v44  ;;  %v1098_v11 = vmul.f32 (%p1071_p6), 0.33333334, %v1082_v9  ;;  %v1136_v44 = vadd.f32 (%p1071_p6), %v1120_v35, %v1104_v38 }
 0x156   : > { %1140 = vst [vmem:[%s2050_s12] sm:$0xff] (%p1071_p6), %v1124_v61 }
 0x157   : > { %v1038_v49 = vmul.f32 %v1021_v47, %v907_v46  ;;  %1075 = sbr.rel (!%p1071_p6) target bundleno = 360 (0x168), region = 90  ;;  %v1130_v21 = vadd.f32 (%p1071_p6), %v1114_v12, %v1098_v11  ;;  %v1123_v47 = vld [vmem:[%s2030_s26 + $0x78] sm:$0xff] (%p1071_p6)  ;;  %1151 = vst [vmem:[%s2050_s12 + $0x58] sm:$0xff] (%p1071_p6), %v1135_v41 }
 0x158   : > { %1152 = vst [vmem:[%s2050_s12 + $0x60] sm:$0xff] (%p1071_p6), %v1136_v44 }
 0x159   : > { %v1054_v50 = vadd.f32 %v1038_v49, %v924_v48  ;;  %1146 = vst [vmem:[%s2050_s12 + $0x30] sm:$0xff] (%p1071_p6), %v1130_v21  ;;  %v1137_v48 = vadd.f32 (%p1071_p6), %v1121_v40, %v1105_v39 }
 0x15a   : > { %v1090_v42 = vld [vmem:[%s2050_s12 + $0x70] sm:$0xff] (%p1071_p6) }
 0x15b   : > { %1070 = vst [vmem:[%s2050_s12 + $0x78] sm:$0xff] %v1054_v50  ;;  %v1106_v45 = vmul.f32 (%p1071_p6), 0.33333334, %v1090_v42 }
 0x15c   : > { %v1083_v13 = vld [vmem:[%s2050_s12 + $0x38] sm:$0xff]  ;;  %1153 = vst [vmem:[%s2050_s12 + $0x68] sm:$0xff] %v1137_v48 }
 0x15d   : > { %v1099_v2 = vmul.f32 0.33333334, %v1083_v13  ;;  %v1138_v49 = vadd.f32 %v1122_v16, %v1106_v45 }
 0x15f   : > { %v1131_v25 = vadd.f32 %v1115_v14, %v1099_v2  ;;  %1154 = vst [vmem:[%s2050_s12 + $0x70] sm:$0xff] %v1138_v49 }
 0x161   : > { %1147 = vst [vmem:[%s2050_s12 + $0x38] sm:$0xff] %v1131_v25 }
 0x162   : > { %v1091_v43 = vld [vmem:[%s2050_s12 + $0x78] sm:$0xff] }
 0x163   : > { %v1107_v46 = vmul.f32 0.33333334, %v1091_v43 }
 0x165   : > { %v1139_v50 = vadd.f32 %v1123_v47, %v1107_v46 }
 0x167   : > { %1155 = vst [vmem:[%s2050_s12 + $0x78] sm:$0xff] %v1139_v50 }
 0x168 PF: > { %s1505_s18 = sshll.u32 %s1767_s19, 7  ;;  %s1169_s25 = sshll.u32 %s2050_s12, 4  ;;  %s1170_s25 = int_to_ptr.vmem [resolvable:$true] %s1169_s25 }
 0x169   : > { %s1168_s21 = scalar_lea.hbm %s2262_s4, %s1505_s18  ;;  %s1157_s17 = scalar_lea.sflag [#allocation4], %s2026_s20 }
 0x16a   : > { %s1171_s26 = sshll.u32 %s1168_s21, 4  ;;  %s1697_s19 = scalar_lea.hbm %s2262_s4, 256  ;;  %s1172_s26 = int_to_ptr.hbm [resolvable:$true] %s1171_s26 }
 0x16b   : > { %s1691_s28 = sshra.s32 %s1172_s26, 4  ;;  %s1692_s28 = int_to_ptr.hbm [resolvable:$true] %s1691_s28 }
 0x16c   : > { %s1693_s8 = scalar_lea.hbm %s1692_s28, 128  ;;  %p1698_p0 = scmp.lt.s32.totalorder %s1692_s28, %s2262_s4 }
 0x16d   : > { %p1694_p9 = scmp.ne.s32.totalorder %s1692_s28, %s1693_s8  ;;  %p1699_p2 = scmp.lt.s32.totalorder %s1697_s19, %s1693_s8 }
 0x16f   : > { %p1695_p12 = pnand %p1694_p9, %p1884_p10  ;;  %p1700_p1 = por %p1699_p2, %p1698_p0 }
 0x171   : > { %p1696_p13 = pneg %p1695_p12 }
 0x173   : > { %p1701_p4 = pnand %p1700_p1, %p1696_p13 }
 0x175   : > { %1704 = shalt.err (!%p1701_p4)
}
 0x176   : > { %s1788_s20 = smov 128   ;;  %s1789_s10 = smov 8  }
 0x177   : > { %1530 = dma.vmem_to_hbm [thread:$0]  (%p1884_p10), %s1170_s25, 2048, %s1172_s26, %s1157_s17, %s1788_s20, %s1788_s20, %s1789_s10  }
 0x178 PF: > { %p1542_p5 = scmp.ge.s32.totalorder %s1779_s22, 2  ;;  %s1186_s11 = sand.u32 1, %s1751_s15  }
 0x179   : > { %s1187_s29 = scalar_lea.sflag [#allocation4], %s1186_s11 }
 0x17a   : > { %p1537_p3 = pnand %p1542_p5, %p1890_p11 }
 0x17c   : > { %p1538_p7 = pneg %p1537_p3 }
 0x17e   : > { %1746 = dma.done.wait (%p1538_p7), %s1187_s29, 2048  }
 0x17f   : > { %1748 = vsyncadd (%p1538_p7), %s1187_s29, 4294965248  ;;  %s21_s22 = sadd.s32 1, %s1779_s22   ;;  %s2281_s13 = sld [smem:[#allocation12_spill]] }
 0x180   : > { %p18_p8 = scmp.ge.s32.totalorder %s21_s22, 8   ;;  %s2282_s17 = sld [smem:[#allocation17_spill]] }
 0x181   : > { %s2283_s18 = sld [smem:[#allocation13_spill]]  ;;  %s2287_s15 = smov %s1755_s16 }
 0x182   : > { %s2284_s19 = sld [smem:[#allocation14_spill]]  ;;  %20 = sbr.rel (!%p18_p8) target bundleno = 10 (0xa), region = 144 }
 0x183   : > { %s2285_s20 = sld [smem:[#allocation15_spill]] }
 0x184   : > { %s2286_s21 = sld [smem:[#allocation16_spill]] }
 0x185   : > { %s2288_s16 = smov %s2281_s13 }
 0x187   :  { %1193 = vsyncpa [#allocation3], 1 }
 0x188   :  { %1195 = vsyncpa [#allocation3 + $0x1], 1 }
 0x189   :  { %1196 = vsyncpa [#allocation6], 1 }
 0x18a   :  { %1197 = vsyncpa [#allocation4], 1 }
 0x18b   :  { %1199 = vsyncpa [#allocation4 + $0x1], 1 }

</bundles_post_ra>
